<compile_context>
chip_gen: v6e
topology: v6e:2x2x1
jax: 0.10.0
libtpu: 0.0.40
codegen_flags: <defaults>
</compile_context>

<pallas_src>
import jax
import jax.numpy as jnp
from jax.experimental import pallas as pl
from jax.experimental.pallas import tpu as pltpu


def _round_up(v, m):
    return (v + m - 1) // m * m


def _make_fused_mlp_kernel(num_layers, compute_dtype):
    """All `num_layers` Linear+ReLU layers on one batch tile.

    Ref layout: (x_ref, w0, b0, ..., w{L-1}, b{L-1}, o_ref)
      x_ref : (TM, d_in)    f32
      w_l   : (K_l, N_l)    compute_dtype (bf16 default), zero-padded internally
      b_l   : (1, N_l)      f32
      o_ref : (TM, d_out)   f32
    """

    def kernel(*refs):
        x_ref = refs[0]
        o_ref = refs[1 + 2 * num_layers]
        h = x_ref[...].astype(compute_dtype)             # one small cast of the x tile
        for li in range(num_layers):                     # unrolled at trace time
            w = refs[1 + 2 * li][...]                    # already in compute_dtype
            b = refs[2 + 2 * li][...]                    # f32
            y = jnp.dot(h, w, preferred_element_type=jnp.float32)   # MXU, f32 acc
            y = jnp.maximum(y + b, 0.0)                  # bias + ReLU in f32 (v5e-safe)
            if li + 1 < num_layers:
                h = y.astype(compute_dtype)              # bf16 inter-layer activation
            else:
                o_ref[...] = y.astype(o_ref.dtype)

    return kernel


class DnnPallas:
    """JAX/Pallas equivalent of the PyTorch xDeepFM `Dnn` module (eval-mode forward)."""

    def __init__(self, hidden_units, dropout=0.0, key=None, use_bf16_matmul=True):
        if key is None:
            key = jax.random.PRNGKey(0)
        self.hidden_units = list(hidden_units)
        self.dropout = dropout
        self.compute_dtype = jnp.bfloat16 if use_bf16_matmul else jnp.float32
        # TODO(synk): train-mode dropout with p>0 would need pltpu.prng_random_bits masking.

        self.params = []         # unpadded f32 (w_t (in,out), b (out,)) -- reference semantics
        self.padded_params = []  # (weight (K_l, N_l) in compute dtype, bias (1, N_l) f32)
        num_layers = len(self.hidden_units) - 1
        for li, (fan_in, fan_out) in enumerate(zip(hidden_units[:-1], hidden_units[1:])):
            key, kw, kb = jax.random.split(key, 3)
            bound = 1.0 / float(fan_in) ** 0.5           # nn.Linear-style init
            w = jax.random.uniform(kw, (fan_out, fan_in), jnp.float32, -bound, bound)
            b = jax.random.uniform(kb, (fan_out,), jnp.float32, -bound, bound)
            w_t = w.T                                    # (in, out)
            self.params.append((w_t, b))

            # Internal hidden widths padded to 128 (lane-dense, MXU fill). The first
            # layer's K and the last layer's N stay UNPADDED so the wrapper never has
            # to materialize a padded copy of x or slice the output.
            k_pad = fan_in if li == 0 else _round_up(fan_in, 128)
            n_pad = fan_out if li == num_layers - 1 else _round_up(fan_out, 128)
            w_pad = (jnp.zeros((k_pad, n_pad), jnp.float32)
                     .at[:fan_in, :fan_out].set(w_t)).astype(self.compute_dtype)
            b_pad = jnp.zeros((1, n_pad), jnp.float32).at[0, :fan_out].set(b)
            self.padded_params.append((w_pad, b_pad))

        self._single_buffer_weights = None   # resolved on first call (Buffered(1) probe)

    # ---- tiling --------------------------------------------------------------
    @staticmethod
    def _pick_tm(batch):
        b8 = _round_up(max(batch, 1), 8)
        if b8 <= 256:
            return b8                                    # one tile; too small to split
        if b8 <= 1024:
            # >= 2 grid steps so the "parallel" batch axis can shard across v7x's 2
            # TensorCores, floored at 256 rows for MXU M-fill.
            return max(256, _round_up((b8 + 1) // 2, 8))
        return 512

    # ---- fused pallas call ----------------------------------------------------
    def _invoke(self, x, single_buffer_weights):
        B, d_in = x.shape
        num_layers = len(self.padded_params)
        d_out = self.hidden_units[-1]
        TM = self._pick_tm(B)
        grid = (pl.cdiv(B, TM),)

        def weight_spec(shape):
            if single_buffer_weights:
                # Grid-invariant input: one VMEM buffer instead of the default two.
                return pl.BlockSpec(shape, lambda i: (0, 0),
                                    memory_space=pltpu.MemorySpace.VMEM,
                                    pipeline_mode=pl.Buffered(1))
            return pl.BlockSpec(shape, lambda i: (0, 0),
                                memory_space=pltpu.MemorySpace.VMEM)

        in_specs = [pl.BlockSpec((TM, d_in), lambda i: (i, 0),
                                 memory_space=pltpu.MemorySpace.VMEM)]
        flat_params = []
        for w_pad, b_pad in self.padded_params:
            in_specs.append(weight_spec(w_pad.shape))
            in_specs.append(weight_spec(b_pad.shape))
            flat_params.extend((w_pad, b_pad))
        out_specs = pl.BlockSpec((TM, d_out), lambda i: (i, 0),
                                 memory_space=pltpu.MemorySpace.VMEM)

        # Explicit VMEM budget from the actual buffer sizes (the default scoped limit
        # is only 16 MiB on v5e and 32 MiB on v6e/v7x). Weights counted x2 so the limit
        # is never too small even when the double-buffered fallback is used.
        param_bytes = sum(int(w.size) * w.dtype.itemsize + int(b.size) * b.dtype.itemsize
                          for w, b in self.padded_params)
        max_width = max(int(w.shape[1]) for w, _ in self.padded_params)
        x_tile = TM * d_in * x.dtype.itemsize
        o_tile = TM * d_out * 4
        h_tile = TM * max_width * 4
        needed = 2 * (x_tile + o_tile) + 2 * param_bytes + 4 * h_tile + (2 << 20)
        vmem_limit = int(min(max(needed, 32 << 20), 64 << 20))   # 64 MiB = v7x physical

        flops = 2 * B * sum(int(w.shape[0]) * int(w.shape[1])
                            for w, _ in self.padded_params)
        bytes_accessed = (int(x.size) * x.dtype.itemsize + param_bytes + B * d_out * 4)
        cost = pl.CostEstimate(flops=int(flops), transcendentals=0,
                               bytes_accessed=int(bytes_accessed))

        fused = pl.pallas_call(
            _make_fused_mlp_kernel(num_layers, self.compute_dtype),
            out_shape=jax.ShapeDtypeStruct((B, d_out), jnp.float32),
            grid_spec=pltpu.PrefetchScalarGridSpec(
                num_scalar_prefetch=0,
                grid=grid,
                in_specs=in_specs,
                out_specs=out_specs),
            compiler_params=pltpu.CompilerParams(
                dimension_semantics=("parallel",),   # batch tiles shard over v7x's 2 TCs
                vmem_limit_bytes=vmem_limit),
            cost_estimate=cost,
        )
        return fused(x, *flat_params)

    def __call__(self, x):
        B, d_in = x.shape
        assert d_in == self.hidden_units[0]
        if not self.padded_params:                   # no linear layers -> dropout only
            return x
        if x.dtype != jnp.float32:
            x = x.astype(jnp.float32)
        if self._single_buffer_weights is not None:
            return self._invoke(x, self._single_buffer_weights)
        try:
            y = jax.block_until_ready(self._invoke(x, True))
            self._single_buffer_weights = True
            return y
        except Exception:
            # pl.Buffered(1) pipeline_mode unsupported on this jax/backend combination;
            # fall back to default double-buffered weight specs (identical semantics).
            self._single_buffer_weights = False
            return self._invoke(x, False)


if __name__ == "__main__":
    key = jax.random.PRNGKey(0)
    batch = 8
    hidden_units = [32, 64, 32]        # input dim 32 -> 64 -> 32

    k_in, k_params = jax.random.split(key)
    x = jax.random.normal(k_in, (batch, hidden_units[0]), jnp.float32)

    def reference(model, xin):
        h = xin
        for w_t, b in model.params:
            h = jnp.maximum(h @ w_t + b, 0.0)
        return h

    # 1) f32 MXU path: tight tolerance against the plain-JAX reference.
    model_f32 = DnnPallas(hidden_units, dropout=0.0, key=k_params, use_bf16_matmul=False)
    y_f32 = jax.block_until_ready(model_f32(x))
    ref = reference(model_f32, x)
    assert y_f32.shape == (batch, hidden_units[-1])
    assert jnp.allclose(y_f32, ref, atol=1e-4, rtol=1e-4), \
        float(jnp.max(jnp.abs(y_f32 - ref)))

    # 2) Default bf16-MXU path (same key -> identical underlying f32 params): looser
    #    tolerance since MXU inputs are rounded to bf16 (f32 accumulation).
    model_bf16 = DnnPallas(hidden_units, dropout=0.0, key=k_params)  # bf16 default
    y_bf16 = jax.block_until_ready(model_bf16(x))
    assert y_bf16.shape == (batch, hidden_units[-1])
    assert jnp.allclose(y_bf16, ref, atol=5e-2, rtol=5e-2), \
        float(jnp.max(jnp.abs(y_bf16 - ref)))

    print("KERNEL_OK")
</pallas_src>

<mosaic_0001>
module attributes {stable_mosaic.version = 11 : i64} {
  func.func @kernel(%arg0: i32, %arg1: memref<8x32xf32, #tpu.memory_space<vmem>>, %arg2: memref<32x128xf32, #tpu.memory_space<vmem>>, %arg3: memref<1x128xf32, #tpu.memory_space<vmem>>, %arg4: memref<128x32xf32, #tpu.memory_space<vmem>>, %arg5: memref<1x32xf32, #tpu.memory_space<vmem>>, %arg6: memref<8x32xf32, #tpu.memory_space<vmem>>) attributes {dimension_semantics = [#tpu.dimension_semantics<parallel>], iteration_bounds = array<i64: 1>, scalar_prefetch = 0 : i64, scratch_operands = 0 : i64, tpu.core_type = #tpu.core_type<tc>, window_params = [{transform_indices = @transform_0, window_bounds = array<i64: 8, 32>}, {pipeline_mode = #tpu.pipeline_mode<synchronous>, transform_indices = @transform_1, window_bounds = array<i64: 32, 128>}, {pipeline_mode = #tpu.pipeline_mode<synchronous>, transform_indices = @transform_2, window_bounds = array<i64: 1, 128>}, {pipeline_mode = #tpu.pipeline_mode<synchronous>, transform_indices = @transform_3, window_bounds = array<i64: 128, 32>}, {pipeline_mode = #tpu.pipeline_mode<synchronous>, transform_indices = @transform_4, window_bounds = array<i64: 1, 32>}, {transform_indices = @transform_5, window_bounds = array<i64: 8, 32>}]} {
    %c0 = arith.constant 0 : index
    %c0_0 = arith.constant 0 : index
    %0 = vector.load %arg1[%c0, %c0_0] : memref<8x32xf32, #tpu.memory_space<vmem>>, vector<8x32xf32>
    %c0_1 = arith.constant 0 : index
    %c0_2 = arith.constant 0 : index
    %1 = vector.load %arg2[%c0_1, %c0_2] : memref<32x128xf32, #tpu.memory_space<vmem>>, vector<32x128xf32>
    %c0_3 = arith.constant 0 : index
    %c0_4 = arith.constant 0 : index
    %2 = vector.load %arg3[%c0_3, %c0_4] : memref<1x128xf32, #tpu.memory_space<vmem>>, vector<1x128xf32>
    %cst = arith.constant dense<0.000000e+00> : vector<8x128xf32>
    %3 = tpu.matmul %0, %1, %cst {dimension_numbers = #tpu.dot_dimension_numbers<[1], [0], [0], [1], [0, 0, 1, 1], [], []>} : vector<8x32xf32>, vector<32x128xf32>, vector<8x128xf32> -> vector<8x128xf32>
    %4 = vector.broadcast %2 : vector<1x128xf32> to vector<8x128xf32>
    %5 = arith.addf %3, %4 : vector<8x128xf32>
    %cst_5 = arith.constant 0.000000e+00 : f32
    %6 = vector.broadcast %cst_5 : f32 to vector<8x128xf32>
    %7 = arith.maximumf %5, %6 : vector<8x128xf32>
    %c0_6 = arith.constant 0 : index
    %c0_7 = arith.constant 0 : index
    %8 = vector.load %arg4[%c0_6, %c0_7] : memref<128x32xf32, #tpu.memory_space<vmem>>, vector<128x32xf32>
    %c0_8 = arith.constant 0 : index
    %c0_9 = arith.constant 0 : index
    %9 = vector.load %arg5[%c0_8, %c0_9] : memref<1x32xf32, #tpu.memory_space<vmem>>, vector<1x32xf32>
    %cst_10 = arith.constant dense<0.000000e+00> : vector<8x32xf32>
    %10 = tpu.matmul %7, %8, %cst_10 {dimension_numbers = #tpu.dot_dimension_numbers<[1], [0], [0], [1], [0, 0, 1, 1], [], []>} : vector<8x128xf32>, vector<128x32xf32>, vector<8x32xf32> -> vector<8x32xf32>
    %11 = vector.broadcast %9 : vector<1x32xf32> to vector<8x32xf32>
    %12 = arith.addf %10, %11 : vector<8x32xf32>
    %cst_11 = arith.constant 0.000000e+00 : f32
    %13 = vector.broadcast %cst_11 : f32 to vector<8x32xf32>
    %14 = arith.maximumf %12, %13 : vector<8x32xf32>
    %c0_12 = arith.constant 0 : index
    %c0_13 = arith.constant 0 : index
    %15 = vector.load %arg6[%c0_12, %c0_13] : memref<8x32xf32, #tpu.memory_space<vmem>>, vector<8x32xf32>
    tpu.vector_store %arg6[%c0_12, %c0_13], %14 {strides = array<i32>} : memref<8x32xf32, #tpu.memory_space<vmem>>, vector<8x32xf32>,
    return
  }
  func.func @transform_0(%arg0: i32) -> (i32, i32) {
    %c0_i32 = arith.constant 0 : i32
    %c0_i32_0 = arith.constant 0 : i32
    return %arg0, %c0_i32 : i32, i32
  }
  func.func @transform_1(%arg0: i32) -> (i32, i32) {
    %c0_i32 = arith.constant 0 : i32
    %c0_i32_0 = arith.constant 0 : i32
    %c0_i32_1 = arith.constant 0 : i32
    return %c0_i32, %c0_i32_0 : i32, i32
  }
  func.func @transform_2(%arg0: i32) -> (i32, i32) {
    %c0_i32 = arith.constant 0 : i32
    %c0_i32_0 = arith.constant 0 : i32
    %c0_i32_1 = arith.constant 0 : i32
    return %c0_i32, %c0_i32_0 : i32, i32
  }
  func.func @transform_3(%arg0: i32) -> (i32, i32) {
    %c0_i32 = arith.constant 0 : i32
    %c0_i32_0 = arith.constant 0 : i32
    %c0_i32_1 = arith.constant 0 : i32
    return %c0_i32, %c0_i32_0 : i32, i32
  }
  func.func @transform_4(%arg0: i32) -> (i32, i32) {
    %c0_i32 = arith.constant 0 : i32
    %c0_i32_0 = arith.constant 0 : i32
    %c0_i32_1 = arith.constant 0 : i32
    return %c0_i32, %c0_i32_0 : i32, i32
  }
  func.func @transform_5(%arg0: i32) -> (i32, i32) {
    %c0_i32 = arith.constant 0 : i32
    %c0_i32_0 = arith.constant 0 : i32
    return %arg0, %c0_i32 : i32, i32
  }
}

module attributes {stable_mosaic.version = 11 : i64} {
  func.func @kernel(%arg0: i32, %arg1: memref<8x32xf32, #tpu.memory_space<vmem>>, %arg2: memref<32x128xf32, #tpu.memory_space<vmem>>, %arg3: memref<1x128xf32, #tpu.memory_space<vmem>>, %arg4: memref<128x32xf32, #tpu.memory_space<vmem>>, %arg5: memref<1x32xf32, #tpu.memory_space<vmem>>, %arg6: memref<8x32xf32, #tpu.memory_space<vmem>>) attributes {dimension_semantics = [#tpu.dimension_semantics<parallel>], iteration_bounds = array<i64: 1>, scalar_prefetch = 0 : i64, scratch_operands = 0 : i64, tpu.core_type = #tpu.core_type<tc>, window_params = [{transform_indices = @transform_0, window_bounds = array<i64: 8, 32>}, {pipeline_mode = #tpu.pipeline_mode<synchronous>, transform_indices = @transform_1, window_bounds = array<i64: 32, 128>}, {pipeline_mode = #tpu.pipeline_mode<synchronous>, transform_indices = @transform_2, window_bounds = array<i64: 1, 128>}, {pipeline_mode = #tpu.pipeline_mode<synchronous>, transform_indices = @transform_3, window_bounds = array<i64: 128, 32>}, {pipeline_mode = #tpu.pipeline_mode<synchronous>, transform_indices = @transform_4, window_bounds = array<i64: 1, 32>}, {transform_indices = @transform_5, window_bounds = array<i64: 8, 32>}]} {
    %c0 = arith.constant 0 : index
    %c0_0 = arith.constant 0 : index
    %0 = vector.load %arg1[%c0, %c0_0] : memref<8x32xf32, #tpu.memory_space<vmem>>, vector<8x32xf32>
    %c0_1 = arith.constant 0 : index
    %c0_2 = arith.constant 0 : index
    %1 = vector.load %arg2[%c0_1, %c0_2] : memref<32x128xf32, #tpu.memory_space<vmem>>, vector<32x128xf32>
    %c0_3 = arith.constant 0 : index
    %c0_4 = arith.constant 0 : index
    %2 = vector.load %arg3[%c0_3, %c0_4] : memref<1x128xf32, #tpu.memory_space<vmem>>, vector<1x128xf32>
    %cst = arith.constant dense<0.000000e+00> : vector<8x128xf32>
    %3 = tpu.matmul %0, %1, %cst {dimension_numbers = #tpu.dot_dimension_numbers<[1], [0], [0], [1], [0, 0, 1, 1], [], []>} : vector<8x32xf32>, vector<32x128xf32>, vector<8x128xf32> -> vector<8x128xf32>
    %4 = vector.broadcast %2 : vector<1x128xf32> to vector<8x128xf32>
    %5 = arith.addf %3, %4 : vector<8x128xf32>
    %cst_5 = arith.constant 0.000000e+00 : f32
    %6 = vector.broadcast %cst_5 : f32 to vector<8x128xf32>
    %7 = arith.maximumf %5, %6 : vector<8x128xf32>
    %c0_6 = arith.constant 0 : index
    %c0_7 = arith.constant 0 : index
    %8 = vector.load %arg4[%c0_6, %c0_7] : memref<128x32xf32, #tpu.memory_space<vmem>>, vector<128x32xf32>
    %c0_8 = arith.constant 0 : index
    %c0_9 = arith.constant 0 : index
    %9 = vector.load %arg5[%c0_8, %c0_9] : memref<1x32xf32, #tpu.memory_space<vmem>>, vector<1x32xf32>
    %cst_10 = arith.constant dense<0.000000e+00> : vector<8x32xf32>
    %10 = tpu.matmul %7, %8, %cst_10 {dimension_numbers = #tpu.dot_dimension_numbers<[1], [0], [0], [1], [0, 0, 1, 1], [], []>} : vector<8x128xf32>, vector<128x32xf32>, vector<8x32xf32> -> vector<8x32xf32>
    %11 = vector.broadcast %9 : vector<1x32xf32> to vector<8x32xf32>
    %12 = arith.addf %10, %11 : vector<8x32xf32>
    %cst_11 = arith.constant 0.000000e+00 : f32
    %13 = vector.broadcast %cst_11 : f32 to vector<8x32xf32>
    %14 = arith.maximumf %12, %13 : vector<8x32xf32>
    %c0_12 = arith.constant 0 : index
    %c0_13 = arith.constant 0 : index
    %15 = vector.load %arg6[%c0_12, %c0_13] : memref<8x32xf32, #tpu.memory_space<vmem>>, vector<8x32xf32>
    tpu.vector_store %arg6[%c0_12, %c0_13], %14 {strides = array<i32>} : memref<8x32xf32, #tpu.memory_space<vmem>>, vector<8x32xf32>,
    return
  }
  func.func @transform_0(%arg0: i32) -> (i32, i32) {
    %c0_i32 = arith.constant 0 : i32
    %c0_i32_0 = arith.constant 0 : i32
    return %arg0, %c0_i32 : i32, i32
  }
  func.func @transform_1(%arg0: i32) -> (i32, i32) {
    %c0_i32 = arith.constant 0 : i32
    %c0_i32_0 = arith.constant 0 : i32
    %c0_i32_1 = arith.constant 0 : i32
    return %c0_i32, %c0_i32_0 : i32, i32
  }
  func.func @transform_2(%arg0: i32) -> (i32, i32) {
    %c0_i32 = arith.constant 0 : i32
    %c0_i32_0 = arith.constant 0 : i32
    %c0_i32_1 = arith.constant 0 : i32
    return %c0_i32, %c0_i32_0 : i32, i32
  }
  func.func @transform_3(%arg0: i32) -> (i32, i32) {
    %c0_i32 = arith.constant 0 : i32
    %c0_i32_0 = arith.constant 0 : i32
    %c0_i32_1 = arith.constant 0 : i32
    return %c0_i32, %c0_i32_0 : i32, i32
  }
  func.func @transform_4(%arg0: i32) -> (i32, i32) {
    %c0_i32 = arith.constant 0 : i32
    %c0_i32_0 = arith.constant 0 : i32
    %c0_i32_1 = arith.constant 0 : i32
    return %c0_i32, %c0_i32_0 : i32, i32
  }
  func.func @transform_5(%arg0: i32) -> (i32, i32) {
    %c0_i32 = arith.constant 0 : i32
    %c0_i32_0 = arith.constant 0 : i32
    return %arg0, %c0_i32 : i32, i32
  }
}

</mosaic_0001>

<bundles_post_ra>
// kernel: tpu_custom_call.1
= control target key start
LH: loop header
LB: loop body
LE: loop exit
PB: predicated region body
PF: predicated region fallthrough
CT: control target
= control target key end

     0   :  { %v313_v1 = vmov 0.0   ;;  %vm314_vm0 = vmmov 0   ;;  %vm33_vm1 = vcmask 261120   ;;  %s444_s0 = inlined_call_operand.vmem [shape: f32[8,32], index: 0, kind: input, shape index: {}]   ;;  %s445_s1 = inlined_call_operand.vmem [shape: f32[32,128], index: 1, kind: input, shape index: {}]   ;;  %s446_s2 = inlined_call_operand.vmem [shape: f32[1,128], index: 2, kind: input, shape index: {}]   ;;  %s447_s3 = inlined_call_operand.vmem [shape: f32[128,32], index: 3, kind: input, shape index: {}]   ;;  %s448_s4 = inlined_call_operand.vmem [shape: f32[1,32], index: 4, kind: input, shape index: {}]   ;;  %s449_s5 = inlined_call_operand.hbm [shape: f32[8,32], index: 5, kind: output, shape index: {}]  }
   0x1   :  { %v25_v0 = vld [vmem:[%s445_s1 + $0x18] sm:$0xff]  ;;  %242 = vmatprep.subr.mxu0 %v313_v1  ;;  %v24_v2 = vld [vmem:[%s445_s1 + $0x10] sm:$0xff]  ;;  %250 = vmatprep.mubr.msk.f32.mxu0 %vm314_vm0, %v313_v1  ;;  %v23_v5 = vld [vmem:[%s445_s1 + $0x8] sm:$0xff] }
   0x2   :  { %v123_v3 = vld [vmem:[%s447_s3 + $0x78] sm:$0xff]  ;;  %243 = vmatpush3.msra.mxu0 %v25_v0  ;;  %253 = vmatprep.subr.mxu1 %v313_v1  ;;  %v122_v4 = vld [vmem:[%s447_s3 + $0x70] sm:$0xff]  ;;  %v121_v6 = vld [vmem:[%s447_s3 + $0x68] sm:$0xff] }
   0x3   :  { %244 = vmatprep.subr.mxu0 %v313_v1  ;;  %254 = vmatpush3.msra.mxu1 %v123_v3  ;;  %v22_v7 = vld [vmem:[%s445_s1] sm:$0xff] }
   0x4   :  { %245 = vmatpush3.msra.mxu0 %v24_v2  ;;  %255 = vmatprep.subr.mxu1 %v313_v1  ;;  %v21_v8 = vld [vmem:[%s444_s0] sm:$0xff] }
   0x5   :  { %246 = vmatprep.subr.mxu0 %v313_v1  ;;  %256 = vmatpush3.msra.mxu1 %v122_v4  ;;  %v120_v9 = vld [vmem:[%s447_s3 + $0x60] sm:$0xff] }
   0x6   :  { %247 = vmatpush3.msra.mxu0 %v23_v5  ;;  %257 = vmatprep.subr.mxu1 %v313_v1 }
   0x7   :  { %10 = vsyncpa [#allocation3], 0  ;;  %248 = vmatprep.subr.mxu0 %v313_v1  ;;  %258 = vmatpush3.msra.mxu1 %v121_v6  ;;  %v119_v10 = vld [vmem:[%s447_s3 + $0x58] sm:$0xff]  ;;  %v118_v11 = vld [vmem:[%s447_s3 + $0x50] sm:$0xff]  ;;  %s315_s11 = smov [#allocation2]  }
   0x8   :  { %249 = vmatpush3.msra.mxu0 %v22_v7  ;;  %259 = vmatprep.subr.mxu1 %v313_v1  ;;  %v117_v12 = vld [vmem:[%s447_s3 + $0x48] sm:$0xff]  ;;  %v116_v13 = vld [vmem:[%s447_s3 + $0x40] sm:$0xff]  ;;  %v115_v14 = vld [vmem:[%s447_s3 + $0x38] sm:$0xff]  ;;  %s209_s0 = sshll.u32 %s315_s11, 4  ;;  %s210_s0 = int_to_ptr.vmem [resolvable:$true] %s209_s0 }
   0x9   :  { %251 = vmatmul.mubr.msk.f32.vlgmr.msra.gmra.mxu0 %vm33_vm1, %v21_v8  ;;  %260 = vmatpush3.msra.mxu1 %v120_v9  ;;  %v114_v15 = vld [vmem:[%s447_s3 + $0x30] sm:$0xff]  ;;  %v113_v16 = vld [vmem:[%s447_s3 + $0x28] sm:$0xff]  ;;  %v112_v17 = vld [vmem:[%s447_s3 + $0x20] sm:$0xff]  ;;  %p296_p1 = scmp.lt.s32.totalorder %s210_s0, %s210_s0 }
   0xa   :  { %261 = vmatprep.subr.mxu1 %v313_v1  ;;  %285 = vmatprep.mubr.msk.f32.mxu1 %vm314_vm0, %v313_v1  ;;  %v111_v18 = vld [vmem:[%s447_s3 + $0x18] sm:$0xff]  ;;  %v110_v19 = vld [vmem:[%s447_s3 + $0x10] sm:$0xff]  ;;  %v109_v20 = vld [vmem:[%s447_s3 + $0x8] sm:$0xff] }
   0xb   :  { %262 = vmatpush3.msra.mxu1 %v119_v10  ;;  %v108_v21 = vld [vmem:[%s447_s3] sm:$0xff]  ;;  %s291_s3 = scalar_lea.vmem %s210_s0, 128 }
   0xc   :  { %263 = vmatprep.subr.mxu1 %v313_v1  ;;  %v217_v22 = vld [vmem:[%s446_s2] ss:$0 sm:$0xff]  ;;  %p292_p0 = scmp.ne.s32.totalorder %s210_s0, %s291_s3  ;;  %p297_p2 = scmp.lt.s32.totalorder %s291_s3, %s291_s3 }
   0xd   :  { %264 = vmatpush3.msra.mxu1 %v118_v11  ;;  %v219_v27 = vld [vmem:[%s448_s4] ss:$0 sm:$0xff] }
   0xe   :  { %265 = vmatprep.subr.mxu1 %v313_v1  ;;  %p298_p3 = por %p297_p2, %p296_p1 }
   0xf   :  { %266 = vmatpush3.msra.mxu1 %v117_v12 }
  0x10   :  { %267 = vmatprep.subr.mxu1 %v313_v1  ;;  %p299_p4 = pnand %p298_p3, %p292_p0 }
  0x11   :  { %268 = vmatpush3.msra.mxu1 %v116_v13 }
  0x12   :  { %269 = vmatprep.subr.mxu1 %v313_v1 }
  0x13   :  { %270 = vmatpush3.msra.mxu1 %v115_v14 }
  0x14   :  { %271 = vmatprep.subr.mxu1 %v313_v1 }
  0x15   :  { %272 = vmatpush3.msra.mxu1 %v114_v15 }
  0x16   :  { %273 = vmatprep.subr.mxu1 %v313_v1 }
  0x17   :  { %274 = vmatpush3.msra.mxu1 %v113_v16 }
  0x18   :  { %275 = vmatprep.subr.mxu1 %v313_v1 }
  0x19   :  { %276 = vmatpush3.msra.mxu1 %v112_v17 }
  0x1a   :  { %277 = vmatprep.subr.mxu1 %v313_v1 }
  0x1b   :  { %278 = vmatpush3.msra.mxu1 %v111_v18 }
  0x1c   :  { %279 = vmatprep.subr.mxu1 %v313_v1 }
  0x1d   :  { %280 = vmatpush3.msra.mxu1 %v110_v19 }
  0x1e   :  { %281 = vmatprep.subr.mxu1 %v313_v1 }
  0x1f   :  { %282 = vmatpush3.msra.mxu1 %v109_v20 }
  0x20   :  { %283 = vmatprep.subr.mxu1 %v313_v1 }
  0x21   :  { %284 = vmatpush3.msra.mxu1 %v108_v21 }
  0xc9   :  { %v103_v23 = vpop.f32.mrf.mxu0 }
  0xca   :  { %v104_v24 = vadd.f32 %v217_v22, %v103_v23 }
  0xcb   :  { %v252_v25 = vpop.f32.mrf.mxu0 }
  0xcc   :  { %v107_v26 = vmax.f32 %v104_v24, 0.0 }
  0xce   :  { %286 = vmatmul.mubr.f32.vlgmr.msra.gmra.mxu1 %v107_v26 }
 0x18e   :  { %v197_v28 = vpop.f32.mrf.mxu1 }
 0x18f   :  { %v198_v29 = vadd.f32 %v219_v27, %v197_v28 }
 0x190   :  { %v287_v30 = vpop.f32.mrf.mxu1 }
 0x191   :  { %v201_v31 = vmax.f32 %v198_v29, 0.0 }
 0x193   :  { %202 = vst.msk [vmem:[#allocation2] sm:$0xff] %vm33_vm1, %v201_v31 }
 0x194   :  { %302 = shalt.err (!%p299_p4)
}
 0x195   :  { %212 = dma.vmem_to_hbm [thread:$0]  %s210_s0, 128, %s449_s5, [#allocation3]  }
 0x196   :  { %311 = dma.done.wait [#allocation3], 128  }
 0x197   :  { %312 = vsyncadd [#allocation3], 4294967168 }
 0x198   :  { %216 = vsyncpa [#allocation3], 1 }

// kernel: tpu_custom_call.1
= control target key start
LH: loop header
LB: loop body
LE: loop exit
PB: predicated region body
PF: predicated region fallthrough
CT: control target
= control target key end

     0   :  { %v313_v1 = vmov 0.0   ;;  %vm314_vm0 = vmmov 0   ;;  %vm33_vm1 = vcmask 261120   ;;  %s444_s0 = inlined_call_operand.vmem [shape: f32[8,32], index: 0, kind: input, shape index: {}]   ;;  %s445_s1 = inlined_call_operand.vmem [shape: f32[32,128], index: 1, kind: input, shape index: {}]   ;;  %s446_s2 = inlined_call_operand.vmem [shape: f32[1,128], index: 2, kind: input, shape index: {}]   ;;  %s447_s3 = inlined_call_operand.vmem [shape: f32[128,32], index: 3, kind: input, shape index: {}]   ;;  %s448_s4 = inlined_call_operand.vmem [shape: f32[1,32], index: 4, kind: input, shape index: {}]   ;;  %s449_s5 = inlined_call_operand.hbm [shape: f32[8,32], index: 5, kind: output, shape index: {}]  }
   0x1   :  { %v25_v0 = vld [vmem:[%s445_s1 + $0x18] sm:$0xff]  ;;  %242 = vmatprep.subr.mxu0 %v313_v1  ;;  %v24_v2 = vld [vmem:[%s445_s1 + $0x10] sm:$0xff]  ;;  %250 = vmatprep.mubr.msk.f32.mxu0 %vm314_vm0, %v313_v1  ;;  %v23_v5 = vld [vmem:[%s445_s1 + $0x8] sm:$0xff] }
   0x2   :  { %v123_v3 = vld [vmem:[%s447_s3 + $0x78] sm:$0xff]  ;;  %243 = vmatpush3.msra.mxu0 %v25_v0  ;;  %253 = vmatprep.subr.mxu1 %v313_v1  ;;  %v122_v4 = vld [vmem:[%s447_s3 + $0x70] sm:$0xff]  ;;  %v121_v6 = vld [vmem:[%s447_s3 + $0x68] sm:$0xff] }
   0x3   :  { %244 = vmatprep.subr.mxu0 %v313_v1  ;;  %254 = vmatpush3.msra.mxu1 %v123_v3  ;;  %v22_v7 = vld [vmem:[%s445_s1] sm:$0xff] }
   0x4   :  { %245 = vmatpush3.msra.mxu0 %v24_v2  ;;  %255 = vmatprep.subr.mxu1 %v313_v1  ;;  %v21_v8 = vld [vmem:[%s444_s0] sm:$0xff] }
   0x5   :  { %246 = vmatprep.subr.mxu0 %v313_v1  ;;  %256 = vmatpush3.msra.mxu1 %v122_v4  ;;  %v120_v9 = vld [vmem:[%s447_s3 + $0x60] sm:$0xff] }
   0x6   :  { %247 = vmatpush3.msra.mxu0 %v23_v5  ;;  %257 = vmatprep.subr.mxu1 %v313_v1 }
   0x7   :  { %10 = vsyncpa [#allocation3], 0  ;;  %248 = vmatprep.subr.mxu0 %v313_v1  ;;  %258 = vmatpush3.msra.mxu1 %v121_v6  ;;  %v119_v10 = vld [vmem:[%s447_s3 + $0x58] sm:$0xff]  ;;  %v118_v11 = vld [vmem:[%s447_s3 + $0x50] sm:$0xff]  ;;  %s315_s11 = smov [#allocation2]  }
   0x8   :  { %249 = vmatpush3.msra.mxu0 %v22_v7  ;;  %259 = vmatprep.subr.mxu1 %v313_v1  ;;  %v117_v12 = vld [vmem:[%s447_s3 + $0x48] sm:$0xff]  ;;  %v116_v13 = vld [vmem:[%s447_s3 + $0x40] sm:$0xff]  ;;  %v115_v14 = vld [vmem:[%s447_s3 + $0x38] sm:$0xff]  ;;  %s209_s0 = sshll.u32 %s315_s11, 4  ;;  %s210_s0 = int_to_ptr.vmem [resolvable:$true] %s209_s0 }
   0x9   :  { %251 = vmatmul.mubr.msk.f32.vlgmr.msra.gmra.mxu0 %vm33_vm1, %v21_v8  ;;  %260 = vmatpush3.msra.mxu1 %v120_v9  ;;  %v114_v15 = vld [vmem:[%s447_s3 + $0x30] sm:$0xff]  ;;  %v113_v16 = vld [vmem:[%s447_s3 + $0x28] sm:$0xff]  ;;  %v112_v17 = vld [vmem:[%s447_s3 + $0x20] sm:$0xff]  ;;  %p296_p1 = scmp.lt.s32.totalorder %s210_s0, %s210_s0 }
   0xa   :  { %261 = vmatprep.subr.mxu1 %v313_v1  ;;  %285 = vmatprep.mubr.msk.f32.mxu1 %vm314_vm0, %v313_v1  ;;  %v111_v18 = vld [vmem:[%s447_s3 + $0x18] sm:$0xff]  ;;  %v110_v19 = vld [vmem:[%s447_s3 + $0x10] sm:$0xff]  ;;  %v109_v20 = vld [vmem:[%s447_s3 + $0x8] sm:$0xff] }
   0xb   :  { %262 = vmatpush3.msra.mxu1 %v119_v10  ;;  %v108_v21 = vld [vmem:[%s447_s3] sm:$0xff]  ;;  %s291_s3 = scalar_lea.vmem %s210_s0, 128 }
   0xc   :  { %263 = vmatprep.subr.mxu1 %v313_v1  ;;  %v217_v22 = vld [vmem:[%s446_s2] ss:$0 sm:$0xff]  ;;  %p292_p0 = scmp.ne.s32.totalorder %s210_s0, %s291_s3  ;;  %p297_p2 = scmp.lt.s32.totalorder %s291_s3, %s291_s3 }
   0xd   :  { %264 = vmatpush3.msra.mxu1 %v118_v11  ;;  %v219_v27 = vld [vmem:[%s448_s4] ss:$0 sm:$0xff] }
   0xe   :  { %265 = vmatprep.subr.mxu1 %v313_v1  ;;  %p298_p3 = por %p297_p2, %p296_p1 }
   0xf   :  { %266 = vmatpush3.msra.mxu1 %v117_v12 }
  0x10   :  { %267 = vmatprep.subr.mxu1 %v313_v1  ;;  %p299_p4 = pnand %p298_p3, %p292_p0 }
  0x11   :  { %268 = vmatpush3.msra.mxu1 %v116_v13 }
  0x12   :  { %269 = vmatprep.subr.mxu1 %v313_v1 }
  0x13   :  { %270 = vmatpush3.msra.mxu1 %v115_v14 }
  0x14   :  { %271 = vmatprep.subr.mxu1 %v313_v1 }
  0x15   :  { %272 = vmatpush3.msra.mxu1 %v114_v15 }
  0x16   :  { %273 = vmatprep.subr.mxu1 %v313_v1 }
  0x17   :  { %274 = vmatpush3.msra.mxu1 %v113_v16 }
  0x18   :  { %275 = vmatprep.subr.mxu1 %v313_v1 }
  0x19   :  { %276 = vmatpush3.msra.mxu1 %v112_v17 }
  0x1a   :  { %277 = vmatprep.subr.mxu1 %v313_v1 }
  0x1b   :  { %278 = vmatpush3.msra.mxu1 %v111_v18 }
  0x1c   :  { %279 = vmatprep.subr.mxu1 %v313_v1 }
  0x1d   :  { %280 = vmatpush3.msra.mxu1 %v110_v19 }
  0x1e   :  { %281 = vmatprep.subr.mxu1 %v313_v1 }
  0x1f   :  { %282 = vmatpush3.msra.mxu1 %v109_v20 }
  0x20   :  { %283 = vmatprep.subr.mxu1 %v313_v1 }
  0x21   :  { %284 = vmatpush3.msra.mxu1 %v108_v21 }
  0xc9   :  { %v103_v23 = vpop.f32.mrf.mxu0 }
  0xca   :  { %v104_v24 = vadd.f32 %v217_v22, %v103_v23 }
  0xcb   :  { %v252_v25 = vpop.f32.mrf.mxu0 }
  0xcc   :  { %v107_v26 = vmax.f32 %v104_v24, 0.0 }
  0xce   :  { %286 = vmatmul.mubr.f32.vlgmr.msra.gmra.mxu1 %v107_v26 }
 0x18e   :  { %v197_v28 = vpop.f32.mrf.mxu1 }
 0x18f   :  { %v198_v29 = vadd.f32 %v219_v27, %v197_v28 }
 0x190   :  { %v287_v30 = vpop.f32.mrf.mxu1 }
 0x191   :  { %v201_v31 = vmax.f32 %v198_v29, 0.0 }
 0x193   :  { %202 = vst.msk [vmem:[#allocation2] sm:$0xff] %vm33_vm1, %v201_v31 }
 0x194   :  { %302 = shalt.err (!%p299_p4)
}
 0x195   :  { %212 = dma.vmem_to_hbm [thread:$0]  %s210_s0, 128, %s449_s5, [#allocation3]  }
 0x196   :  { %311 = dma.done.wait [#allocation3], 128  }
 0x197   :  { %312 = vsyncadd [#allocation3], 4294967168 }
 0x198   :  { %216 = vsyncpa [#allocation3], 1 }

</bundles_post_ra>
